<compile_context>
chip_gen: v7x
topology: tpu7x:2x2x1
jax: 0.10.0
libtpu: 0.0.40
codegen_flags: <defaults>
</compile_context>

<pallas_src>
import functools

import jax
import jax.numpy as jnp
from jax.experimental import pallas as pl
from jax.experimental.pallas import tpu as pltpu


_LANE = 128          # lane width (last dim alignment)
_SUBLANE = 8         # f32 sublane height (second-to-last dim alignment)
_MIB = 1024 * 1024


def _round_up(x, m):
    return ((x + m - 1) // m) * m


# ----------------------------------------------------------------------------
# Generation-aware resource policy.
#   v5e/v6e: 128 MiB VMEM, 1 TensorCore      -> big budget, 512-row tiles
#   v7x    : 64 MiB VMEM per TC, 2 TCs/chip  -> tighter budget, split rows
# ----------------------------------------------------------------------------
def _detect_tpu():
    kind = ""
    try:
        kind = (getattr(jax.devices()[0], "device_kind", "") or "").lower()
    except Exception:
        pass
    is_v7 = ("v7" in kind) or ("tpu7" in kind)
    is_v5e = ("v5e" in kind) or ("v5 lite" in kind) or ("v5lite" in kind)
    vmem = None
    try:
        info = pltpu.get_tpu_info()
        vmem = int(getattr(info, "vmem_capacity_bytes", 0)) or None
    except Exception:
        vmem = None
    if vmem is None:
        # No info: only assume the big 128 MiB VMEM if we positively know the
        # chip is not v7x; otherwise stay conservative (64 MiB).
        vmem = (128 if (kind and not is_v7) else 64) * _MIB
    num_tc = 2 if is_v7 else 1
    return vmem, num_tc, is_v5e


_VMEM_PHYS, _NUM_TC, _IS_V5E = _detect_tpu()
_VMEM_CAP = (3 * _VMEM_PHYS) // 4                 # ~96 MiB v5e/v6e, ~48 MiB v7x
_FUSED_VMEM_BUDGET = max(_VMEM_CAP - 8 * _MIB, 16 * _MIB)
_ROW_TILE = 256 if _NUM_TC >= 2 else 512          # bigger rows where VMEM permits
_MAX_TILE = 512                                    # multiple of 256 (v6e/v7x MXU) and 128
_K_TILE_CAP_F32 = 2048
_K_TILE_CAP_BF16 = 4096


def _vmem_limit(estimate_bytes):
    lo = min(32 * _MIB, _VMEM_CAP)
    return int(min(max(estimate_bytes + 2 * _MIB, lo), _VMEM_CAP))


def _pad2d(a, rows, cols):
    r, c = a.shape
    if r == rows and c == cols:
        return a
    return jnp.pad(a, ((0, rows - r), (0, cols - c)))


# ----------------------------------------------------------------------------
# Fused multi-layer kernel: weights resident in VMEM (single-buffered),
# intermediates never leave VMEM, grid only over batch-row tiles.
# ----------------------------------------------------------------------------
def _make_fused_kernel(n_layers, use_bf16):
    def kernel(x_ref, *refs):
        o_ref = refs[-1]
        h = x_ref[...]
        for l in range(n_layers):
            hin = h.astype(jnp.bfloat16) if use_bf16 else h
            w = refs[2 * l][...]
            b = refs[2 * l + 1][...].astype(jnp.float32)
            y = jnp.dot(hin, w, preferred_element_type=jnp.float32)
            h = jnp.maximum(y + b, 0.0)          # bias + ReLU in f32
        o_ref[...] = h.astype(o_ref.dtype)
    return kernel


def _fused_vmem_estimate(tm, pdims, itemsize):
    # x/out tiles double-buffered by the pipeline; weights/biases are
    # pl.Buffered(1) (grid-invariant) so they count only once.
    x_tile = tm * pdims[0] * itemsize
    o_tile = tm * pdims[-1] * 4
    wb = sum(pdims[l] * pdims[l + 1] * itemsize + pdims[l + 1] * 4
             for l in range(len(pdims) - 1))
    inter = tm * max(pdims) * 4                  # largest f32 intermediate
    return 2 * (x_tile + o_tile) + wb + 2 * inter


def _fused_row_tile(M):
    m8 = _round_up(max(M, _SUBLANE), _SUBLANE)
    if _NUM_TC >= 2 and 2 * _SUBLANE <= m8 <= 2 * _ROW_TILE:
        # v7x: exactly 2 balanced row tiles so both TensorCores get work,
        # with minimal row padding.
        tm = _round_up((m8 + 1) // 2, _SUBLANE)
    else:
        tm = min(m8, _ROW_TILE)
    Mp = _round_up(m8, tm)
    return tm, Mp


def fused_mlp(x, params, *, use_bf16=False):
    M, D0 = x.shape
    dims = [D0] + [w.shape[1] for w, _ in params]
    pdims = [_round_up(d, _LANE) for d in dims]  # lane-aligned feature dims

    tm, Mp = _fused_row_tile(M)

    in_dtype = jnp.bfloat16 if use_bf16 else x.dtype
    itemsize = 2 if use_bf16 else x.dtype.itemsize
    xp = _pad2d(x, Mp, pdims[0]).astype(in_dtype)

    ops = [xp]
    in_specs = [pl.BlockSpec((tm, pdims[0]), lambda i: (i, 0))]
    flops = 0
    bytes_accessed = Mp * pdims[0] * itemsize + Mp * pdims[-1] * x.dtype.itemsize
    for l, (w, b) in enumerate(params):
        din, dout = pdims[l], pdims[l + 1]
        wp = _pad2d(w, din, dout).astype(in_dtype)
        bp = jnp.pad(b, (0, dout - b.shape[0])).reshape(1, dout).astype(jnp.float32)
        ops += [wp, bp]
        # Grid-invariant blocks -> single buffer (no pointless double-buffer).
        in_specs += [
            pl.BlockSpec((din, dout), lambda i: (0, 0),
                         pipeline_mode=pl.Buffered(1)),
            pl.BlockSpec((1, dout), lambda i: (0, 0),
                         pipeline_mode=pl.Buffered(1)),
        ]
        flops += 2 * Mp * din * dout + 2 * Mp * dout
        bytes_accessed += din * dout * itemsize + dout * 4

    est = _fused_vmem_estimate(tm, pdims, itemsize)
    out = pl.pallas_call(
        _make_fused_kernel(len(params), use_bf16),
        out_shape=jax.ShapeDtypeStruct((Mp, pdims[-1]), x.dtype),
        grid_spec=pltpu.PrefetchScalarGridSpec(
            num_scalar_prefetch=0,
            grid=(Mp // tm,),
            in_specs=in_specs,
            out_specs=pl.BlockSpec((tm, pdims[-1]), lambda i: (i, 0)),
        ),
        compiler_params=pltpu.CompilerParams(
            dimension_semantics=("parallel",),      # row tiles shard across TCs on v7x
            vmem_limit_bytes=_vmem_limit(est),
        ),
        cost_estimate=pl.CostEstimate(
            flops=int(flops), transcendentals=0,
            bytes_accessed=int(bytes_accessed)),
    )(*ops)
    return out[:M, :dims[-1]]


# ----------------------------------------------------------------------------
# Fallback: single Linear+ReLU layer, tiled. Single-pass kernel when the whole
# contraction fits one K tile, otherwise (M, N, K) grid with K last.
# ----------------------------------------------------------------------------
def _linear_relu_1pass_kernel(x_ref, w_ref, b_ref, o_ref):
    y = jnp.dot(x_ref[...], w_ref[...], preferred_element_type=jnp.float32)
    o_ref[...] = jnp.maximum(y + b_ref[...].astype(jnp.float32), 0.0).astype(o_ref.dtype)


def _linear_relu_acc_kernel(x_ref, w_ref, b_ref, o_ref, acc_ref):
    k = pl.program_id(2)

    @pl.when(k == 0)
    def _():
        # Fold the bias into the accumulator init: no separate epilogue add.
        acc_ref[...] = jnp.broadcast_to(
            b_ref[...].astype(jnp.float32), acc_ref.shape)

    acc_ref[...] += jnp.dot(
        x_ref[...], w_ref[...], preferred_element_type=jnp.float32)

    @pl.when(k == pl.num_programs(2) - 1)
    def _():
        o_ref[...] = jnp.maximum(acc_ref[...], 0.0).astype(o_ref.dtype)


def _fallback_tiles(M, K, N, itemsize):
    # M rows: sublane-aligned, capped at _MAX_TILE.
    m8 = _round_up(max(M, _SUBLANE), _SUBLANE)
    tm = min(m8, _MAX_TILE)
    # N columns: lane-aligned; _MAX_TILE is a multiple of 256 so multi-tile N
    # tiles are MXU-pass-aligned on v6e/v7x.
    n128 = _round_up(max(N, _LANE), _LANE)
    tn = min(n128, _MAX_TILE)
    Np = _round_up(n128, tn)
    # v7x: guarantee >=2 steps on the (i, j) parallel axes so both TCs work.
    if _NUM_TC >= 2 and (_round_up(m8, tm) // tm) * (Np // tn) < 2:
        if m8 >= 2 * _SUBLANE:
            tm = _round_up((m8 + 1) // 2, _SUBLANE)
        elif n128 >= 2 * _LANE:
            tn = _round_up(n128 // 2, _LANE)
            Np = _round_up(n128, tn)
    Mp = _round_up(m8, tm)

    # K: a single tile whenever it fits (collapses the reduction loop to one
    # MXU pass per (i, j) tile); otherwise the fewest 256-aligned K tiles
    # that keep the double-buffered working set within budget.
    k128 = _round_up(max(K, _LANE), _LANE)
    k_cap = _K_TILE_CAP_BF16 if itemsize == 2 else _K_TILE_CAP_F32
    budget = min(24 * _MIB, _VMEM_CAP // 2)

    def vmem_est(tk_):
        return (2 * (tm * tk_ + tk_ * tn) * itemsize
                + 2 * (tn * 4 + tm * tn * 4) + tm * tn * 4)

    steps = max(1, -(-k128 // k_cap))
    tk = _round_up(-(-k128 // steps), 256) if k128 > 256 else k128
    while tk > 256 and vmem_est(tk) > budget:
        steps += 1
        tk = _round_up(-(-k128 // steps), 256)
    Kp = _round_up(k128, tk)
    return tm, Mp, tk, Kp, tn, Np


def _fallback_vmem_estimate(tm, tk, tn, itemsize, single_pass):
    est = 2 * ((tm * tk + tk * tn) * itemsize + tn * 4 + tm * tn * 4)
    if not single_pass:
        est += tm * tn * 4                       # f32 accumulator scratch
        if _IS_V5E:
            est += tk * tn * itemsize            # extra weight buffer (Buffered(3))
    return est


def linear_relu(x, w, b, *, use_bf16=False):
    """relu(x @ w + b) with x:[M,K], w:[K,N], b:[N] -> [M,N]; arbitrary shapes."""
    M, K = x.shape
    K2, N = w.shape
    assert K == K2

    in_dtype = jnp.bfloat16 if use_bf16 else x.dtype
    itemsize = 2 if use_bf16 else x.dtype.itemsize

    tm, Mp, tk, Kp, tn, Np = _fallback_tiles(M, K, N, itemsize)

    xp = _pad2d(x, Mp, Kp).astype(in_dtype)      # zero padding -> no acc pollution
    wp = _pad2d(w, Kp, Np).astype(in_dtype)
    bp = jnp.pad(b, (0, Np - N)).reshape(1, Np).astype(jnp.float32)

    ce = pl.CostEstimate(
        flops=int(2 * Mp * Kp * Np + 2 * Mp * Np),
        transcendentals=0,
        bytes_accessed=int((Mp * Kp + Kp * Np) * itemsize + Np * 4
                           + Mp * Np * x.dtype.itemsize))

    single_pass = (Kp == tk)
    est = _fallback_vmem_estimate(tm, tk, tn, itemsize, single_pass)
    vmem_bytes = _vmem_limit(est)

    if single_pass:
        out = pl.pallas_call(
            _linear_relu_1pass_kernel,
            out_shape=jax.ShapeDtypeStruct((Mp, Np), x.dtype),
            grid_spec=pltpu.PrefetchScalarGridSpec(
                num_scalar_prefetch=0,
                grid=(Mp // tm, Np // tn),
                in_specs=[
                    pl.BlockSpec((tm, Kp), lambda i, j: (i, 0)),   # x tile (full K)
                    pl.BlockSpec((Kp, tn), lambda i, j: (0, j)),   # w tile (full K)
                    pl.BlockSpec((1, tn), lambda i, j: (0, j)),    # bias tile
                ],
                out_specs=pl.BlockSpec((tm, tn), lambda i, j: (i, j)),
            ),
            compiler_params=pltpu.CompilerParams(
                dimension_semantics=("parallel", "parallel"),
                vmem_limit_bytes=vmem_bytes,
            ),
            cost_estimate=ce,
        )(xp, wp, bp)
    else:
        # v5e: 3-deep buffering on the streamed weight hides one extra K step
        # of weight DMA behind the MXU (lowest HBM BW of the three chips).
        if _IS_V5E:
            w_spec = pl.BlockSpec((tk, tn), lambda i, j, k: (k, j),
                                  pipeline_mode=pl.Buffered(3))
        else:
            w_spec = pl.BlockSpec((tk, tn), lambda i, j, k: (k, j))
        out = pl.pallas_call(
            _linear_relu_acc_kernel,
            out_shape=jax.ShapeDtypeStruct((Mp, Np), x.dtype),
            grid_spec=pltpu.PrefetchScalarGridSpec(
                num_scalar_prefetch=0,
                grid=(Mp // tm, Np // tn, Kp // tk),
                in_specs=[
                    pl.BlockSpec((tm, tk), lambda i, j, k: (i, k)),   # x tile
                    w_spec,                                           # w tile
                    pl.BlockSpec((1, tn), lambda i, j, k: (0, j)),    # bias tile
                ],
                out_specs=pl.BlockSpec((tm, tn), lambda i, j, k: (i, j)),
                scratch_shapes=[pltpu.VMEM((tm, tn), jnp.float32)],
            ),
            compiler_params=pltpu.CompilerParams(
                dimension_semantics=("parallel", "parallel", "arbitrary"),
                vmem_limit_bytes=vmem_bytes,
            ),
            cost_estimate=ce,
        )(xp, wp, bp)
    return out[:M, :N]


# ----------------------------------------------------------------------------
# Module-level forward + param init
# ----------------------------------------------------------------------------
def init_mlp_params(key, input_dim, hidden_dims, dtype=jnp.float32):
    """Per layer: (W[in, out], b[out]) — W is nn.Linear weight transposed."""
    dims = [input_dim] + list(hidden_dims)
    params = []
    for m, n in zip(dims, dims[1:]):
        key, kw, kb = jax.random.split(key, 3)
        bound = 1.0 / (m ** 0.5)  # PyTorch default uniform bound
        w = jax.random.uniform(kw, (m, n), dtype=dtype, minval=-bound, maxval=bound)
        b = jax.random.uniform(kb, (n,), dtype=dtype, minval=-bound, maxval=bound)
        params.append((w, b))
    return params


@functools.partial(jax.jit, static_argnames=("use_bf16", "fuse"))
def mlp_forward(x, params, *, use_bf16=False, fuse=True):
    """Sequential(Linear, ReLU, Dropout(p=0)) per layer; Dropout(0) == identity.

    use_bf16=True is the fast path (bf16 MXU inputs, f32 accumulation):
    ~2-4x matmul throughput on v6e/v7x and half the weight VMEM/DMA, at the
    cost of bf16 rounding vs. the f32 PyTorch module (default stays f32).
    """
    if fuse:
        M, D0 = x.shape
        pdims = [_round_up(D0, _LANE)] + [_round_up(w.shape[1], _LANE)
                                          for w, _ in params]
        tm, _ = _fused_row_tile(M)
        itemsize = 2 if use_bf16 else x.dtype.itemsize
        if _fused_vmem_estimate(tm, pdims, itemsize) <= _FUSED_VMEM_BUDGET:
            return fused_mlp(x, params, use_bf16=use_bf16)
    # Weights too large to keep resident (or fusion disabled): per-layer tiled.
    for w, b in params:
        x = linear_relu(x, w, b, use_bf16=use_bf16)
    return x


def _ref_mlp(x, params):
    # Plain-JAX reference (same math as the PyTorch forward), highest precision.
    h = x
    for w, b in params:
        h = jnp.maximum(
            jnp.dot(h, w, precision=jax.lax.Precision.HIGHEST) + b, 0.0)
    return h


if __name__ == "__main__":
    key = jax.random.PRNGKey(0)
    kx, kp, kx2, kp2 = jax.random.split(key, 4)

    # Small, deliberately non-aligned shapes (exercise the padding path):
    # batch=6 pads to 8 rows, input_dim=200 pads to 256 lanes, hidden 96 -> 128.
    batch, input_dim, hidden_dims = 6, 200, [128, 96]
    x = jax.random.normal(kx, (batch, input_dim), dtype=jnp.float32)
    params = init_mlp_params(kp, input_dim, hidden_dims)
    ref = _ref_mlp(x, params)

    out_fused = jax.block_until_ready(mlp_forward(x, params, fuse=True))
    out_tiled = jax.block_until_ready(mlp_forward(x, params, fuse=False))
    out_bf16 = jax.block_until_ready(mlp_forward(x, params, fuse=True, use_bf16=True))

    assert out_fused.shape == (batch, hidden_dims[-1])
    assert out_tiled.shape == (batch, hidden_dims[-1])
    assert jnp.allclose(out_fused, ref, atol=2e-4, rtol=2e-4)
    assert jnp.allclose(out_tiled, ref, atol=2e-4, rtol=2e-4)
    assert jnp.allclose(out_bf16, ref, atol=5e-2, rtol=5e-2)   # bf16 fast path

    # Exercise the fallback's multi-K-step accumulator kernel (K > one K tile).
    x2 = jax.random.normal(kx2, (6, 2200), dtype=jnp.float32)
    (w2, b2), = init_mlp_params(kp2, 2200, [100])
    out2 = jax.block_until_ready(linear_relu(x2, w2, b2))
    ref2 = jnp.maximum(
        jnp.dot(x2, w2, precision=jax.lax.Precision.HIGHEST) + b2, 0.0)
    assert out2.shape == (6, 100)
    assert jnp.allclose(out2, ref2, atol=1e-3, rtol=1e-3)

    print("KERNEL_OK")
</pallas_src>

<mosaic_0001>
module attributes {stable_mosaic.version = 11 : i64} {
  func.func @kernel(%arg0: i32, %arg1: memref<8x256xf32, #tpu.memory_space<vmem>>, %arg2: memref<256x128xf32, #tpu.memory_space<vmem>>, %arg3: memref<1x128xf32, #tpu.memory_space<vmem>>, %arg4: memref<128x128xf32, #tpu.memory_space<vmem>>, %arg5: memref<1x128xf32, #tpu.memory_space<vmem>>, %arg6: memref<8x128xf32, #tpu.memory_space<vmem>>) attributes {dimension_semantics = [#tpu.dimension_semantics<parallel>], iteration_bounds = array<i64: 1>, scalar_prefetch = 0 : i64, scratch_operands = 0 : i64, tpu.core_type = #tpu.core_type<tc>, window_params = [{transform_indices = @transform_0, window_bounds = array<i64: 8, 256>}, {pipeline_mode = #tpu.pipeline_mode<synchronous>, transform_indices = @transform_1, window_bounds = array<i64: 256, 128>}, {pipeline_mode = #tpu.pipeline_mode<synchronous>, transform_indices = @transform_2, window_bounds = array<i64: 1, 128>}, {pipeline_mode = #tpu.pipeline_mode<synchronous>, transform_indices = @transform_3, window_bounds = array<i64: 128, 128>}, {pipeline_mode = #tpu.pipeline_mode<synchronous>, transform_indices = @transform_4, window_bounds = array<i64: 1, 128>}, {transform_indices = @transform_5, window_bounds = array<i64: 8, 128>}]} {
    %c0 = arith.constant 0 : index
    %c0_0 = arith.constant 0 : index
    %0 = vector.load %arg1[%c0, %c0_0] : memref<8x256xf32, #tpu.memory_space<vmem>>, vector<8x256xf32>
    %c0_1 = arith.constant 0 : index
    %c0_2 = arith.constant 0 : index
    %1 = vector.load %arg2[%c0_1, %c0_2] : memref<256x128xf32, #tpu.memory_space<vmem>>, vector<256x128xf32>
    %c0_3 = arith.constant 0 : index
    %c0_4 = arith.constant 0 : index
    %2 = vector.load %arg3[%c0_3, %c0_4] : memref<1x128xf32, #tpu.memory_space<vmem>>, vector<1x128xf32>
    %cst = arith.constant dense<0.000000e+00> : vector<8x128xf32>
    %3 = tpu.matmul %0, %1, %cst {dimension_numbers = #tpu.dot_dimension_numbers<[1], [0], [0], [1], [0, 0, 1, 1], [], []>} : vector<8x256xf32>, vector<256x128xf32>, vector<8x128xf32> -> vector<8x128xf32>
    %4 = vector.broadcast %2 : vector<1x128xf32> to vector<8x128xf32>
    %5 = arith.addf %3, %4 : vector<8x128xf32>
    %cst_5 = arith.constant 0.000000e+00 : f32
    %6 = vector.broadcast %cst_5 : f32 to vector<8x128xf32>
    %7 = arith.maximumf %5, %6 : vector<8x128xf32>
    %c0_6 = arith.constant 0 : index
    %c0_7 = arith.constant 0 : index
    %8 = vector.load %arg4[%c0_6, %c0_7] : memref<128x128xf32, #tpu.memory_space<vmem>>, vector<128x128xf32>
    %c0_8 = arith.constant 0 : index
    %c0_9 = arith.constant 0 : index
    %9 = vector.load %arg5[%c0_8, %c0_9] : memref<1x128xf32, #tpu.memory_space<vmem>>, vector<1x128xf32>
    %cst_10 = arith.constant dense<0.000000e+00> : vector<8x128xf32>
    %10 = tpu.matmul %7, %8, %cst_10 {dimension_numbers = #tpu.dot_dimension_numbers<[1], [0], [0], [1], [0, 0, 1, 1], [], []>} : vector<8x128xf32>, vector<128x128xf32>, vector<8x128xf32> -> vector<8x128xf32>
    %11 = vector.broadcast %9 : vector<1x128xf32> to vector<8x128xf32>
    %12 = arith.addf %10, %11 : vector<8x128xf32>
    %cst_11 = arith.constant 0.000000e+00 : f32
    %13 = vector.broadcast %cst_11 : f32 to vector<8x128xf32>
    %14 = arith.maximumf %12, %13 : vector<8x128xf32>
    %c0_12 = arith.constant 0 : index
    %c0_13 = arith.constant 0 : index
    %15 = vector.load %arg6[%c0_12, %c0_13] : memref<8x128xf32, #tpu.memory_space<vmem>>, vector<8x128xf32>
    tpu.vector_store %arg6[%c0_12, %c0_13], %14 {strides = array<i32>} : memref<8x128xf32, #tpu.memory_space<vmem>>, vector<8x128xf32>,
    return
  }
  func.func @transform_0(%arg0: i32) -> (i32, i32) {
    %c0_i32 = arith.constant 0 : i32
    %c0_i32_0 = arith.constant 0 : i32
    return %arg0, %c0_i32 : i32, i32
  }
  func.func @transform_1(%arg0: i32) -> (i32, i32) {
    %c0_i32 = arith.constant 0 : i32
    %c0_i32_0 = arith.constant 0 : i32
    %c0_i32_1 = arith.constant 0 : i32
    return %c0_i32, %c0_i32_0 : i32, i32
  }
  func.func @transform_2(%arg0: i32) -> (i32, i32) {
    %c0_i32 = arith.constant 0 : i32
    %c0_i32_0 = arith.constant 0 : i32
    %c0_i32_1 = arith.constant 0 : i32
    return %c0_i32, %c0_i32_0 : i32, i32
  }
  func.func @transform_3(%arg0: i32) -> (i32, i32) {
    %c0_i32 = arith.constant 0 : i32
    %c0_i32_0 = arith.constant 0 : i32
    %c0_i32_1 = arith.constant 0 : i32
    return %c0_i32, %c0_i32_0 : i32, i32
  }
  func.func @transform_4(%arg0: i32) -> (i32, i32) {
    %c0_i32 = arith.constant 0 : i32
    %c0_i32_0 = arith.constant 0 : i32
    %c0_i32_1 = arith.constant 0 : i32
    return %c0_i32, %c0_i32_0 : i32, i32
  }
  func.func @transform_5(%arg0: i32) -> (i32, i32) {
    %c0_i32 = arith.constant 0 : i32
    %c0_i32_0 = arith.constant 0 : i32
    return %arg0, %c0_i32 : i32, i32
  }
}

</mosaic_0001>

<bundles_post_ra>
// kernel: mlp_forward.1
= control target key start
LH: loop header
LB: loop body
LE: loop exit
PB: predicated region body
PF: predicated region fallthrough
CT: control target
= control target key end

     0   :  { %v415_v7 = vmov 0.0|0.0   ;;  %s625_s0 = inlined_call_operand.vmem [shape: f32[8,256], index: 0, kind: input, shape index: {}]   ;;  %s626_s1 = inlined_call_operand.vmem [shape: f32[256,128], index: 1, kind: input, shape index: {}]   ;;  %s627_s2 = inlined_call_operand.vmem [shape: f32[1,128], index: 2, kind: input, shape index: {}]   ;;  %s628_s3 = inlined_call_operand.vmem [shape: f32[128,128], index: 3, kind: input, shape index: {}]   ;;  %s629_s4 = inlined_call_operand.vmem [shape: f32[1,128], index: 4, kind: input, shape index: {}]   ;;  %s630_s5 = inlined_call_operand.hbm [shape: f32[8,128], index: 5, kind: output, shape index: {}]  }
   0x1   :  { %v39_v0 = vld [vmem:[%s626_s1 + $0x80] sm:$0xff]  ;;  %v40_v1 = vld [vmem:[%s626_s1 + $0x88] sm:$0xff]  ;;  %v41_v5 = vld [vmem:[%s626_s1 + $0x90] sm:$0xff]  ;;  %363 = vmatprep.subr.bf16.mxu1 %v415_v7 }
   0x2   :  { %v23_v2 = vld [vmem:[%s626_s1] sm:$0xff]  ;;  %v331_v3 = vpack.c.bf16 %v40_v1, %v39_v0  ;;  %v24_v4 = vld [vmem:[%s626_s1 + $0x8] sm:$0xff]  ;;  %v42_v6 = vld [vmem:[%s626_s1 + $0x98] sm:$0xff] }
   0x3   :  { %v333_v8 = vpack.c.bf16 %v24_v4, %v23_v2  ;;  %v335_v9 = vpack.c.bf16 %v42_v6, %v41_v5  ;;  %v25_v10 = vld [vmem:[%s626_s1 + $0x10] sm:$0xff]  ;;  %v26_v11 = vld [vmem:[%s626_s1 + $0x18] sm:$0xff]  ;;  %v43_v12 = vld [vmem:[%s626_s1 + $0xa0] sm:$0xff] }
   0x4   :  { %332 = vmatprep.subr.bf16.mxu0 %v331_v3  ;;  %v44_v13 = vld [vmem:[%s626_s1 + $0xa8] sm:$0xff]  ;;  %v337_v14 = vpack.c.bf16 %v26_v11, %v25_v10  ;;  %v27_v16 = vld [vmem:[%s626_s1 + $0x20] sm:$0xff]  ;;  %v45_v18 = vld [vmem:[%s626_s1 + $0xb0] sm:$0xff] }
   0x5   :  { %334 = vmatpush3.bf16.msra.mxu0 %v333_v8  ;;  %v339_v15 = vpack.c.bf16 %v44_v13, %v43_v12  ;;  %v28_v17 = vld [vmem:[%s626_s1 + $0x28] sm:$0xff]  ;;  %v46_v19 = vld [vmem:[%s626_s1 + $0xb8] sm:$0xff]  ;;  %v29_v22 = vld [vmem:[%s626_s1 + $0x30] sm:$0xff] }
   0x6   :  { %336 = vmatprep.subr.bf16.mxu0 %v335_v9  ;;  %v341_v20 = vpack.c.bf16 %v28_v17, %v27_v16  ;;  %v343_v21 = vpack.c.bf16 %v46_v19, %v45_v18  ;;  %v30_v23 = vld [vmem:[%s626_s1 + $0x38] sm:$0xff]  ;;  %v47_v24 = vld [vmem:[%s626_s1 + $0xc0] sm:$0xff]  ;;  %v48_v25 = vld [vmem:[%s626_s1 + $0xc8] sm:$0xff] }
   0x7   :  { %v22_v26 = vld [vmem:[%s625_s0 + $0x8] sm:$0xff]  ;;  %v133_v27 = vld [vmem:[%s628_s3] sm:$0xff]  ;;  %v345_v29 = vpack.c.bf16 %v30_v23, %v29_v22  ;;  %v135_v31 = vld [vmem:[%s628_s3 + $0x10] sm:$0xff]  ;;  %v347_v33 = vpack.c.bf16 %v48_v25, %v47_v24 }
   0x8   :  { %126 = vmatprep.mubr.f32.mxu0 %v22_v26  ;;  %v134_v28 = vld [vmem:[%s628_s3 + $0x8] sm:$0xff]  ;;  %v136_v32 = vld [vmem:[%s628_s3 + $0x18] sm:$0xff]  ;;  %v31_v34 = vld [vmem:[%s626_s1 + $0x40] sm:$0xff] }
   0x9   :  { %338 = vmatpush3.bf16.msra.mxu0 %v337_v14  ;;  %v364_v30 = vpack.c.bf16 %v134_v28, %v133_v27  ;;  %v32_v35 = vld [vmem:[%s626_s1 + $0x48] sm:$0xff]  ;;  %v49_v36 = vld [vmem:[%s626_s1 + $0xd0] sm:$0xff]  ;;  %v50_v37 = vld [vmem:[%s626_s1 + $0xd8] sm:$0xff]  ;;  %v367_v38 = vpack.c.bf16 %v136_v32, %v135_v31 }
   0xa   :  { %340 = vmatprep.subr.bf16.mxu0 %v339_v15  ;;  %v137_v39 = vld [vmem:[%s628_s3 + $0x20] sm:$0xff]  ;;  %v138_v40 = vld [vmem:[%s628_s3 + $0x28] sm:$0xff] }
   0xb   :  { %365 = vmatpush3.bf16.msra.mxu1 %v364_v30 }
   0xc   :  { %366 = vmatprep.subr.bf16.mxu1 %v415_v7 }
   0xd   :  { %342 = vmatpush3.bf16.msra.mxu0 %v341_v20 }
   0xe   :  { %344 = vmatprep.subr.bf16.mxu0 %v343_v21 }
   0xf   :  { %10 = vsyncpa [#allocation3], 0  ;;  %v349_v41 = vpack.c.bf16 %v32_v35, %v31_v34  ;;  %v351_v42 = vpack.c.bf16 %v50_v37, %v49_v36  ;;  %v33_v43 = vld [vmem:[%s626_s1 + $0x50] sm:$0xff]  ;;  %v34_v44 = vld [vmem:[%s626_s1 + $0x58] sm:$0xff]  ;;  %368 = vmatpush3.bf16.msra.mxu1 %v367_v38  ;;  %v370_v47 = vpack.c.bf16 %v138_v40, %v137_v39  ;;  %vm416_vm0 = vmmov 0  }
  0x10   :  { %v51_v45 = vld [vmem:[%s626_s1 + $0xe0] sm:$0xff]  ;;  %v52_v46 = vld [vmem:[%s626_s1 + $0xe8] sm:$0xff]  ;;  %369 = vmatprep.subr.bf16.mxu1 %v415_v7  ;;  %v139_v48 = vld [vmem:[%s628_s3 + $0x30] sm:$0xff]  ;;  %v353_v50 = vpack.c.bf16 %v34_v44, %v33_v43  ;;  %v417_v12 = vmov 0.0  }
  0x11   :  { %346 = vmatpush3.bf16.msra.mxu0 %v345_v29  ;;  %v140_v49 = vld [vmem:[%s628_s3 + $0x38] sm:$0xff]  ;;  %v355_v51 = vpack.c.bf16 %v52_v46, %v51_v45  ;;  %v35_v52 = vld [vmem:[%s626_s1 + $0x60] sm:$0xff]  ;;  %v36_v53 = vld [vmem:[%s626_s1 + $0x68] sm:$0xff]  ;;  %328 = vmatprep.mubr.msk.f32.mxu1 %vm416_vm0, %v417_v12 }
  0x12   :  { %348 = vmatprep.subr.bf16.mxu0 %v347_v33  ;;  %v53_v54 = vld [vmem:[%s626_s1 + $0xf0] sm:$0xff]  ;;  %v54_v55 = vld [vmem:[%s626_s1 + $0xf8] sm:$0xff]  ;;  %v373_v56 = vpack.c.bf16 %v140_v49, %v139_v48  ;;  %v141_v57 = vld [vmem:[%s628_s3 + $0x40] sm:$0xff]  ;;  %v357_v59 = vpack.c.bf16 %v36_v53, %v35_v52 }
  0x13   :  { %371 = vmatpush3.bf16.msra.mxu1 %v370_v47  ;;  %v142_v58 = vld [vmem:[%s628_s3 + $0x48] sm:$0xff]  ;;  %v359_v60 = vpack.c.bf16 %v54_v55, %v53_v54  ;;  %v37_v61 = vld [vmem:[%s626_s1 + $0x70] sm:$0xff]  ;;  %v38_v62 = vld [vmem:[%s626_s1 + $0x78] sm:$0xff] }
  0x14   :  { %372 = vmatprep.subr.bf16.mxu1 %v415_v7  ;;  %v376_v63 = vpack.c.bf16 %v142_v58, %v141_v57  ;;  %v143_v0 = vld [vmem:[%s628_s3 + $0x50] sm:$0xff]  ;;  %v144_v1 = vld [vmem:[%s628_s3 + $0x58] sm:$0xff]  ;;  %v361_v2 = vpack.c.bf16 %v38_v62, %v37_v61  ;;  %v21_v4 = vld [vmem:[%s625_s0] sm:$0xff] }
  0x15   :  { %350 = vmatpush3.bf16.msra.mxu0 %v349_v41  ;;  %v379_v3 = vpack.c.bf16 %v144_v1, %v143_v0  ;;  %v145_v5 = vld [vmem:[%s628_s3 + $0x60] sm:$0xff]  ;;  %v146_v6 = vld [vmem:[%s628_s3 + $0x68] sm:$0xff]  ;;  %v147_v9 = vld [vmem:[%s628_s3 + $0x70] sm:$0xff] }
  0x16   :  { %352 = vmatprep.subr.bf16.mxu0 %v351_v42  ;;  %v382_v8 = vpack.c.bf16 %v146_v6, %v145_v5  ;;  %v148_v10 = vld [vmem:[%s628_s3 + $0x78] sm:$0xff]  ;;  %v242_v14 = vld [vmem:[%s627_s2] ss:$0 sm:$0xff]  ;;  %s418_s3 = smov [#allocation2]  }
  0x17   :  { %374 = vmatpush3.bf16.msra.mxu1 %v373_v56  ;;  %v385_v11 = vpack.c.bf16 %v148_v10, %v147_v9  ;;  %v243_v18 = vld [vmem:[%s629_s4] ss:$0 sm:$0xff]  ;;  %s234_s20 = sshll.u32 %s418_s3, 4  ;;  %s235_s20 = int_to_ptr.vmem [resolvable:$true] %s234_s20 }
  0x18   :  { %375 = vmatprep.subr.bf16.mxu1 %v415_v7  ;;  %s391_s21 = scalar_lea.vmem %s235_s20, 128  ;;  %p396_p1 = scmp.lt.s32.totalorder %s235_s20, %s235_s20 }
  0x19   :  { %354 = vmatpush3.bf16.msra.mxu0 %v353_v50  ;;  %p392_p0 = scmp.ne.s32.totalorder %s235_s20, %s391_s21  ;;  %p397_p2 = scmp.lt.s32.totalorder %s391_s21, %s391_s21 }
  0x1a   :  { %356 = vmatprep.subr.bf16.mxu0 %v355_v51 }
  0x1b   :  { %377 = vmatpush3.bf16.msra.mxu1 %v376_v63  ;;  %p398_p3 = por %p397_p2, %p396_p1 }
  0x1c   :  { %378 = vmatprep.subr.bf16.mxu1 %v415_v7 }
  0x1d   :  { %358 = vmatpush3.bf16.msra.mxu0 %v357_v59  ;;  %p399_p4 = pnand %p398_p3, %p392_p0 }
  0x1e   :  { %360 = vmatprep.subr.bf16.mxu0 %v359_v60 }
  0x1f   :  { %380 = vmatpush3.bf16.msra.mxu1 %v379_v3 }
  0x20   :  { %381 = vmatprep.subr.bf16.mxu1 %v415_v7 }
  0x21   :  { %362 = vmatpush3.bf16.msra.mxu0 %v361_v2 }
  0x23   :  { %383 = vmatpush3.bf16.msra.mxu1 %v382_v8 }
  0x24   :  { %127 = vmatmul.mubr.f32.vlgmr.msra.gmra.mrb[0].mxu0 %v21_v4  ;;  %384 = vmatprep.subr.bf16.mxu1 %v415_v7 }
  0x27   :  { %386 = vmatpush3.bf16.msra.mxu1 %v385_v11 }
  0xf7   :  { %v276_v13 = vpop.f32.mrb[0].mxu0 }
  0xf8   :  { %v277_v15 = vpop.f32.mrb[1].mxu0 }
  0xf9   :  { %v278_v7 = vadd.f32 %v277_v15, %v276_v13 }
  0xfb   :  { %v129_v16 = vadd.f32 %v278_v7, %v242_v14 }
  0xfd   :  { %v132_v17 = vmax.f32 %v129_v16, 0.0 }
  0xff   :  { %329 = vmatmul.mubr.f32.vlgmr.msra.gmra.mrb[0].mxu1 %v132_v17 }
 0x1d2   :  { %v222_v19 = vpop.f32.mrb[0].mxu1 }
 0x1d3   :  { %v223_v20 = vadd.f32 %v243_v18, %v222_v19  ;;  %v330_v21 = vpop.f32.mrb[1].mxu1 }
 0x1d5   :  { %v226_v22 = vmax.f32 %v223_v20, 0.0 }
 0x1d7   :  { %227 = vst [vmem:[#allocation2] sm:$0xff] %v226_v22 }
 0x1d8   :  { %402 = shalt.err (!%p399_p4)
}
 0x1d9   :  { %s403_s23 = scalar_lea.hbm %s630_s5, 128 }
 0x1da   :  { %p404_p5 = scmp.ne.s32.totalorder %s630_s5, %s403_s23  ;;  %p407_p6 = scmp.lt.u32.totalorder %s403_s23, %s630_s5 }
 0x1dc   :  { %p409_p7 = pnand %p407_p6, %p404_p5 }
 0x1de   :  { %412 = shalt.err (!%p409_p7)
}
 0x1df   :  { %237 = dma.vmem_to_hbm [thread:$0]  %s235_s20, 128, %s630_s5, [#allocation3]  }
 0x1e0   :  { %413 = dma.done.wait [#allocation3], 128  }
 0x1e1   :  { %414 = vsyncadd [#allocation3], 4294967168 }
 0x1e2   :  { %241 = vsyncpa [#allocation3], 1 }

</bundles_post_ra>
